<compile_context>
chip_gen: v6e
topology: v6e:2x2x1
jax: 0.10.0
libtpu: 0.0.40
codegen_flags: <defaults>
</compile_context>

<pallas_src>
import jax
import jax.numpy as jnp
from jax.experimental import pallas as pl
from jax.experimental.pallas import tpu as pltpu


def _round_up(n, m):
    return ((n + m - 1) // m) * m


def relation_extractor_kernel(
    x_ref,
    w1_ref, b1_ref,
    w2_ref, b2_ref,
    w3_ref, b3_ref,
    w4_ref, b4_ref,
    out_ref,
):
    # Fused hot path: 4 MXU matmuls (bf16 in, f32 acc) + f32 bias adds + 3 ReLUs.
    # dropout(p=0.4) -> identity at inference time.
    x = x_ref[...].astype(jnp.bfloat16)                               # (TM, 32)

    h = jnp.dot(x, w1_ref[...], preferred_element_type=jnp.float32) + b1_ref[...]
    h = jnp.maximum(h, 0.0)

    h = jnp.dot(h.astype(jnp.bfloat16), w2_ref[...],
                preferred_element_type=jnp.float32) + b2_ref[...]
    h = jnp.maximum(h, 0.0)

    h = jnp.dot(h.astype(jnp.bfloat16), w3_ref[...],
                preferred_element_type=jnp.float32) + b3_ref[...]
    h = jnp.maximum(h, 0.0)

    y = jnp.dot(h.astype(jnp.bfloat16), w4_ref[...],
                preferred_element_type=jnp.float32) + b4_ref[...]
    out_ref[...] = y.astype(out_ref.dtype)                            # (TM, 19)


def prepare_params(params):
    """One-time (outside the hot path) bf16 cast of the weights.

    Weights keep their natural shapes: (32,256), (256,256), (256,256), (256,19).
    Each is passed as a single full-array block, so the non-128 trailing dims
    are legal; no zero-padding of w1/w4/b4 is needed.
    """
    return dict(
        w1=params["w1"].astype(jnp.bfloat16), b1=params["b1"].astype(jnp.float32),
        w2=params["w2"].astype(jnp.bfloat16), b2=params["b2"].astype(jnp.float32),
        w3=params["w3"].astype(jnp.bfloat16), b3=params["b3"].astype(jnp.float32),
        w4=params["w4"].astype(jnp.bfloat16), b4=params["b4"].astype(jnp.float32),
    )


def _pick_batch_tiling(B, tm_max=1024):
    """Choose (TM, B_pad) for the 1-D batch grid.

    - TM capped at tm_max (sized against v7x's 64 MiB VMEM; v5e/v6e have more).
    - For mid/large batches force >= 2 (and an even number of) grid steps so
      dimension_semantics=("parallel",) shards across both v7x TensorCores.
    - Steps are balanced (TM ~= B8 / steps) to avoid a mostly-padding last tile.
    """
    B8 = _round_up(max(B, 8), 8)
    steps = max(1, -(-B8 // tm_max))
    if steps == 1 and B8 >= 256:   # big enough that splitting beats step overhead
        steps = 2
    if steps > 1 and steps % 2:
        steps += 1                 # even step count -> balanced 2-TC split on v7x
    TM = _round_up(-(-B8 // steps), 8)
    B_pad = _round_up(B8, TM)
    return TM, B_pad


def relation_extractor_forward(x, prepped, *, tm_max=1024):
    """x: [B, input_dim] float32 -> [B, 19] float32."""
    B, in_dim = x.shape
    out_dim = prepped["w4"].shape[1]

    TM, B_pad = _pick_batch_tiling(B, tm_max)
    x_p = x if B_pad == B else jnp.pad(x, ((0, B_pad - B), (0, 0)))

    resident = lambda shape: pl.BlockSpec(shape, lambda i: (0, 0))  # VMEM-resident

    out = pl.pallas_call(
        relation_extractor_kernel,
        out_shape=jax.ShapeDtypeStruct((B_pad, out_dim), jnp.float32),
        grid=(B_pad // TM,),
        in_specs=[
            pl.BlockSpec((TM, in_dim), lambda i: (i, 0)),           # raw f32 x, cast in-kernel
            resident(prepped["w1"].shape), resident(prepped["b1"].shape),
            resident(prepped["w2"].shape), resident(prepped["b2"].shape),
            resident(prepped["w3"].shape), resident(prepped["b3"].shape),
            resident(prepped["w4"].shape), resident(prepped["b4"].shape),
        ],
        out_specs=pl.BlockSpec((TM, out_dim), lambda i: (i, 0)),
        compiler_params=pltpu.CompilerParams(
            dimension_semantics=("parallel",),   # batch tiles shard across v7x TCs
            vmem_limit_bytes=32 << 20,           # TM<=1024: resident+temps << 32 MiB
        ),
    )(
        x_p,
        prepped["w1"], prepped["b1"],
        prepped["w2"], prepped["b2"],
        prepped["w3"], prepped["b3"],
        prepped["w4"], prepped["b4"],
    )

    return out if B_pad == B else out[:B]


def init_params(key, input_dim, hidden=256, out_dim=19):
    """Deterministic init mimicking PyTorch nn.Linear (uniform +/- 1/sqrt(fan_in))."""
    dims = [(input_dim, hidden), (hidden, hidden), (hidden, hidden), (hidden, out_dim)]
    params = {}
    for i, (fan_in, fan_out) in enumerate(dims, start=1):
        key, kw, kb = jax.random.split(key, 3)
        bound = 1.0 / jnp.sqrt(float(fan_in))
        params[f"w{i}"] = jax.random.uniform(
            kw, (fan_in, fan_out), jnp.float32, minval=-bound, maxval=bound
        )
        params[f"b{i}"] = jax.random.uniform(
            kb, (1, fan_out), jnp.float32, minval=-bound, maxval=bound
        )
    return params


def reference_forward(x, params):
    # Pure f32 reference matching PyTorch semantics (dropout elided at inference).
    h = jnp.maximum(x @ params["w1"] + params["b1"], 0.0)
    h = jnp.maximum(h @ params["w2"] + params["b2"], 0.0)
    h = jnp.maximum(h @ params["w3"] + params["b3"], 0.0)
    return h @ params["w4"] + params["b4"]


if __name__ == "__main__":
    key = jax.random.PRNGKey(0)
    key, kx, kp = jax.random.split(key, 3)

    batch = 8
    input_dim = 32  # feature dimension of the vectorized utterances

    x = jax.random.normal(kx, (batch, input_dim), jnp.float32)
    params = init_params(kp, input_dim)
    prepped = prepare_params(params)

    out = relation_extractor_forward(x, prepped)
    out = jax.block_until_ready(out)

    ref = reference_forward(x, params)
    assert out.shape == (batch, 19), out.shape
    # Tolerance accounts for bf16 weight/activation quantization vs the f32 reference.
    assert jnp.allclose(out, ref, atol=5e-2, rtol=5e-2), "mismatch vs reference"

    print("KERNEL_OK")
</pallas_src>

<mosaic_0001>
module attributes {stable_mosaic.version = 11 : i64} {
  func.func @relation_extractor_kernel(%arg0: i32, %arg1: memref<8x32xf32, #tpu.memory_space<vmem>>, %arg2: memref<32x256xbf16, #tpu.memory_space<vmem>>, %arg3: memref<1x256xf32, #tpu.memory_space<vmem>>, %arg4: memref<256x256xbf16, #tpu.memory_space<vmem>>, %arg5: memref<1x256xf32, #tpu.memory_space<vmem>>, %arg6: memref<256x256xbf16, #tpu.memory_space<vmem>>, %arg7: memref<1x256xf32, #tpu.memory_space<vmem>>, %arg8: memref<256x19xbf16, #tpu.memory_space<vmem>>, %arg9: memref<1x19xf32, #tpu.memory_space<vmem>>, %arg10: memref<8x19xf32, #tpu.memory_space<vmem>>) attributes {dimension_semantics = [#tpu.dimension_semantics<parallel>], iteration_bounds = array<i64: 1>, scalar_prefetch = 0 : i64, scratch_operands = 0 : i64, tpu.core_type = #tpu.core_type<tc>, window_params = [{transform_indices = @transform_0, window_bounds = array<i64: 8, 32>}, {pipeline_mode = #tpu.pipeline_mode<synchronous>, transform_indices = @transform_1, window_bounds = array<i64: 32, 256>}, {pipeline_mode = #tpu.pipeline_mode<synchronous>, transform_indices = @transform_2, window_bounds = array<i64: 1, 256>}, {pipeline_mode = #tpu.pipeline_mode<synchronous>, transform_indices = @transform_3, window_bounds = array<i64: 256, 256>}, {pipeline_mode = #tpu.pipeline_mode<synchronous>, transform_indices = @transform_4, window_bounds = array<i64: 1, 256>}, {pipeline_mode = #tpu.pipeline_mode<synchronous>, transform_indices = @transform_5, window_bounds = array<i64: 256, 256>}, {pipeline_mode = #tpu.pipeline_mode<synchronous>, transform_indices = @transform_6, window_bounds = array<i64: 1, 256>}, {pipeline_mode = #tpu.pipeline_mode<synchronous>, transform_indices = @transform_7, window_bounds = array<i64: 256, 19>}, {pipeline_mode = #tpu.pipeline_mode<synchronous>, transform_indices = @transform_8, window_bounds = array<i64: 1, 19>}, {transform_indices = @transform_9, window_bounds = array<i64: 8, 19>}]} {
    %c0 = arith.constant 0 : index
    %c0_0 = arith.constant 0 : index
    %0 = vector.load %arg1[%c0, %c0_0] : memref<8x32xf32, #tpu.memory_space<vmem>>, vector<8x32xf32>
    %1 = arith.truncf %0 : vector<8x32xf32> to vector<8x32xbf16>
    %c0_1 = arith.constant 0 : index
    %c0_2 = arith.constant 0 : index
    %2 = vector.load %arg2[%c0_1, %c0_2] : memref<32x256xbf16, #tpu.memory_space<vmem>>, vector<32x256xbf16>
    %cst = arith.constant dense<0.000000e+00> : vector<8x256xf32>
    %3 = tpu.matmul %1, %2, %cst {dimension_numbers = #tpu.dot_dimension_numbers<[1], [0], [0], [1], [0, 0, 1, 1], [], []>} : vector<8x32xbf16>, vector<32x256xbf16>, vector<8x256xf32> -> vector<8x256xf32>
    %c0_3 = arith.constant 0 : index
    %c0_4 = arith.constant 0 : index
    %4 = vector.load %arg3[%c0_3, %c0_4] : memref<1x256xf32, #tpu.memory_space<vmem>>, vector<1x256xf32>
    %5 = vector.broadcast %4 : vector<1x256xf32> to vector<8x256xf32>
    %6 = arith.addf %3, %5 : vector<8x256xf32>
    %cst_5 = arith.constant 0.000000e+00 : f32
    %7 = vector.broadcast %cst_5 : f32 to vector<8x256xf32>
    %8 = arith.maximumf %6, %7 : vector<8x256xf32>
    %9 = arith.truncf %8 : vector<8x256xf32> to vector<8x256xbf16>
    %c0_6 = arith.constant 0 : index
    %c0_7 = arith.constant 0 : index
    %10 = vector.load %arg4[%c0_6, %c0_7] : memref<256x256xbf16, #tpu.memory_space<vmem>>, vector<256x256xbf16>
    %cst_8 = arith.constant dense<0.000000e+00> : vector<8x256xf32>
    %11 = tpu.matmul %9, %10, %cst_8 {dimension_numbers = #tpu.dot_dimension_numbers<[1], [0], [0], [1], [0, 0, 1, 1], [], []>} : vector<8x256xbf16>, vector<256x256xbf16>, vector<8x256xf32> -> vector<8x256xf32>
    %c0_9 = arith.constant 0 : index
    %c0_10 = arith.constant 0 : index
    %12 = vector.load %arg5[%c0_9, %c0_10] : memref<1x256xf32, #tpu.memory_space<vmem>>, vector<1x256xf32>
    %13 = vector.broadcast %12 : vector<1x256xf32> to vector<8x256xf32>
    %14 = arith.addf %11, %13 : vector<8x256xf32>
    %cst_11 = arith.constant 0.000000e+00 : f32
    %15 = vector.broadcast %cst_11 : f32 to vector<8x256xf32>
    %16 = arith.maximumf %14, %15 : vector<8x256xf32>
    %17 = arith.truncf %16 : vector<8x256xf32> to vector<8x256xbf16>
    %c0_12 = arith.constant 0 : index
    %c0_13 = arith.constant 0 : index
    %18 = vector.load %arg6[%c0_12, %c0_13] : memref<256x256xbf16, #tpu.memory_space<vmem>>, vector<256x256xbf16>
    %cst_14 = arith.constant dense<0.000000e+00> : vector<8x256xf32>
    %19 = tpu.matmul %17, %18, %cst_14 {dimension_numbers = #tpu.dot_dimension_numbers<[1], [0], [0], [1], [0, 0, 1, 1], [], []>} : vector<8x256xbf16>, vector<256x256xbf16>, vector<8x256xf32> -> vector<8x256xf32>
    %c0_15 = arith.constant 0 : index
    %c0_16 = arith.constant 0 : index
    %20 = vector.load %arg7[%c0_15, %c0_16] : memref<1x256xf32, #tpu.memory_space<vmem>>, vector<1x256xf32>
    %21 = vector.broadcast %20 : vector<1x256xf32> to vector<8x256xf32>
    %22 = arith.addf %19, %21 : vector<8x256xf32>
    %cst_17 = arith.constant 0.000000e+00 : f32
    %23 = vector.broadcast %cst_17 : f32 to vector<8x256xf32>
    %24 = arith.maximumf %22, %23 : vector<8x256xf32>
    %25 = arith.truncf %24 : vector<8x256xf32> to vector<8x256xbf16>
    %c0_18 = arith.constant 0 : index
    %c0_19 = arith.constant 0 : index
    %26 = vector.load %arg8[%c0_18, %c0_19] : memref<256x19xbf16, #tpu.memory_space<vmem>>, vector<256x19xbf16>
    %cst_20 = arith.constant dense<0.000000e+00> : vector<8x19xf32>
    %27 = tpu.matmul %25, %26, %cst_20 {dimension_numbers = #tpu.dot_dimension_numbers<[1], [0], [0], [1], [0, 0, 1, 1], [], []>} : vector<8x256xbf16>, vector<256x19xbf16>, vector<8x19xf32> -> vector<8x19xf32>
    %c0_21 = arith.constant 0 : index
    %c0_22 = arith.constant 0 : index
    %28 = vector.load %arg9[%c0_21, %c0_22] : memref<1x19xf32, #tpu.memory_space<vmem>>, vector<1x19xf32>
    %29 = vector.broadcast %28 : vector<1x19xf32> to vector<8x19xf32>
    %30 = arith.addf %27, %29 : vector<8x19xf32>
    %c0_23 = arith.constant 0 : index
    %c0_24 = arith.constant 0 : index
    %31 = vector.load %arg10[%c0_23, %c0_24] : memref<8x19xf32, #tpu.memory_space<vmem>>, vector<8x19xf32>
    tpu.vector_store %arg10[%c0_23, %c0_24], %30 {strides = array<i32>} : memref<8x19xf32, #tpu.memory_space<vmem>>, vector<8x19xf32>,
    return
  }
  func.func @transform_0(%arg0: i32) -> (i32, i32) {
    %c0_i32 = arith.constant 0 : i32
    %c0_i32_0 = arith.constant 0 : i32
    return %arg0, %c0_i32 : i32, i32
  }
  func.func @transform_1(%arg0: i32) -> (i32, i32) {
    %c0_i32 = arith.constant 0 : i32
    %c0_i32_0 = arith.constant 0 : i32
    %c0_i32_1 = arith.constant 0 : i32
    return %c0_i32, %c0_i32_0 : i32, i32
  }
  func.func @transform_2(%arg0: i32) -> (i32, i32) {
    %c0_i32 = arith.constant 0 : i32
    %c0_i32_0 = arith.constant 0 : i32
    %c0_i32_1 = arith.constant 0 : i32
    return %c0_i32, %c0_i32_0 : i32, i32
  }
  func.func @transform_3(%arg0: i32) -> (i32, i32) {
    %c0_i32 = arith.constant 0 : i32
    %c0_i32_0 = arith.constant 0 : i32
    %c0_i32_1 = arith.constant 0 : i32
    return %c0_i32, %c0_i32_0 : i32, i32
  }
  func.func @transform_4(%arg0: i32) -> (i32, i32) {
    %c0_i32 = arith.constant 0 : i32
    %c0_i32_0 = arith.constant 0 : i32
    %c0_i32_1 = arith.constant 0 : i32
    return %c0_i32, %c0_i32_0 : i32, i32
  }
  func.func @transform_5(%arg0: i32) -> (i32, i32) {
    %c0_i32 = arith.constant 0 : i32
    %c0_i32_0 = arith.constant 0 : i32
    %c0_i32_1 = arith.constant 0 : i32
    return %c0_i32, %c0_i32_0 : i32, i32
  }
  func.func @transform_6(%arg0: i32) -> (i32, i32) {
    %c0_i32 = arith.constant 0 : i32
    %c0_i32_0 = arith.constant 0 : i32
    %c0_i32_1 = arith.constant 0 : i32
    return %c0_i32, %c0_i32_0 : i32, i32
  }
  func.func @transform_7(%arg0: i32) -> (i32, i32) {
    %c0_i32 = arith.constant 0 : i32
    %c0_i32_0 = arith.constant 0 : i32
    %c0_i32_1 = arith.constant 0 : i32
    return %c0_i32, %c0_i32_0 : i32, i32
  }
  func.func @transform_8(%arg0: i32) -> (i32, i32) {
    %c0_i32 = arith.constant 0 : i32
    %c0_i32_0 = arith.constant 0 : i32
    %c0_i32_1 = arith.constant 0 : i32
    return %c0_i32, %c0_i32_0 : i32, i32
  }
  func.func @transform_9(%arg0: i32) -> (i32, i32) {
    %c0_i32 = arith.constant 0 : i32
    %c0_i32_0 = arith.constant 0 : i32
    return %arg0, %c0_i32 : i32, i32
  }
}

</mosaic_0001>

<bundles_post_ra>
// kernel: tpu_custom_call.1
= control target key start
LH: loop header
LB: loop body
LE: loop exit
PB: predicated region body
PF: predicated region fallthrough
CT: control target
= control target key end

     0   :  { %14 = vsyncpa [#allocation3], 0  ;;  %s1288_s0 = inlined_call_operand.vmem [shape: f32[8,32], index: 0, kind: input, shape index: {}]   ;;  %s1289_s1 = inlined_call_operand.vmem [shape: bf16[32,256], index: 1, kind: input, shape index: {}]   ;;  %s1290_s2 = inlined_call_operand.vmem [shape: f32[1,256], index: 2, kind: input, shape index: {}]   ;;  %s1291_s3 = inlined_call_operand.hbm [shape: bf16[256,256], index: 3, kind: input, shape index: {}]   ;;  %s1292_s4 = inlined_call_operand.vmem [shape: f32[1,256], index: 4, kind: input, shape index: {}]   ;;  %s1293_s5 = inlined_call_operand.hbm [shape: bf16[256,256], index: 5, kind: input, shape index: {}]   ;;  %s1294_s6 = inlined_call_operand.vmem [shape: f32[1,256], index: 6, kind: input, shape index: {}]   ;;  %s1295_s7 = inlined_call_operand.vmem [shape: bf16[256,19], index: 7, kind: input, shape index: {}]   ;;  %s1296_s8 = inlined_call_operand.vmem [shape: f32[1,19], index: 8, kind: input, shape index: {}]   ;;  %s1297_s9 = inlined_call_operand.hbm [shape: f32[8,19], index: 9, kind: output, shape index: {}]  }
   0x1   :  { %15 = vsyncpa [#allocation6], 0 }
   0x2   :  { %16 = vsyncpa [#allocation4], 0  ;;  %s1138_s30 = smov [#allocation2]  }
   0x3   :  { %s28_s10 = sshll.u32 %s1138_s30, 4  ;;  %s29_s10 = int_to_ptr.vmem [resolvable:$true] %s28_s10 }
   0x4   :  { %s1080_s11 = scalar_lea.vmem %s29_s10, 4096  ;;  %p1085_p1 = scmp.lt.s32.totalorder %s29_s10, %s29_s10 }
   0x5   :  { %p1081_p0 = scmp.ne.s32.totalorder %s29_s10, %s1080_s11  ;;  %p1086_p2 = scmp.lt.s32.totalorder %s1080_s11, %s1080_s11 }
   0x7   :  { %p1087_p3 = por %p1086_p2, %p1085_p1 }
   0x9   :  { %p1088_p4 = pnand %p1087_p3, %p1081_p0 }
   0xb   :  { %1091 = shalt.err (!%p1088_p4)
}
   0xc   :  { %s1139_s12 = smov 128   ;;  %s1140_s13 = smov 8  }
   0xd   :  { %34 = dma.hbm_to_vmem [thread:$0]  %s1291_s3, 4096, %s29_s10, [#allocation3], %s1139_s12, %s1139_s12, %s1140_s13  }
   0xe   :  { %s1141_s16 = smov [#allocation5]  }
   0xf   :  { %s42_s17 = sshll.u32 %s1141_s16, 4  ;;  %s43_s17 = int_to_ptr.vmem [resolvable:$true] %s42_s17 }
  0x10   :  { %s1100_s18 = scalar_lea.vmem %s43_s17, 4096  ;;  %p1105_p6 = scmp.lt.s32.totalorder %s43_s17, %s43_s17 }
  0x11   :  { %p1101_p5 = scmp.ne.s32.totalorder %s43_s17, %s1100_s18  ;;  %p1106_p7 = scmp.lt.s32.totalorder %s1100_s18, %s1100_s18 }
  0x13   :  { %p1107_p8 = por %p1106_p7, %p1105_p6 }
  0x15   :  { %p1108_p9 = pnand %p1107_p8, %p1101_p5 }
  0x17   :  { %1111 = shalt.err (!%p1108_p9)
}
  0x18   :  { %48 = dma.hbm_to_vmem [thread:$0]  %s1293_s5, 4096, %s43_s17, [#allocation6], %s1139_s12, %s1139_s12, %s1140_s13  }
  0x19   :  { %1132 = dma.done.wait [#allocation3], 4096  }
  0x1a   :  { %1133 = vsyncadd [#allocation3], 4294963200 }
  0x1b   :  { %1134 = dma.done.wait [#allocation6], 4096  }
  0x1c   :  { %1135 = vsyncadd [#allocation6], 4294963200  ;;  %v1142_v0 = vmov 0   ;;  %v954_v1 = vld [vmem:[%s1289_s1 + $0x14] ss:$8 sps:$4 sm:$0xff]   ;;  %v62_v5 = vld [vmem:[%s1288_s0] sm:$0xff] }
  0x1d   :  { %136 = vmatprep.mubr.bf16.mxu0 %v1142_v0  ;;  %v956_v2 = vld [vmem:[%s1289_s1 + $0x10] ss:$8 sps:$4 sm:$0xff]   ;;  %116 = vmatprep.subr.bf16.mxu0 %v954_v1  ;;  %v957_v3 = vld [vmem:[%s1289_s1 + $0x4] ss:$8 sps:$4 sm:$0xff]   ;;  %v959_v4 = vld [vmem:[%s1289_s1] ss:$8 sps:$4 sm:$0xff]   ;;  %v63_v9 = vpack.c.bf16 %v62_v5, %v62_v5 }
  0x1e   :  { %117 = vmatpush1.bf16.msra.mxu0 %v956_v2  ;;  %v960_v6 = vld [vmem:[#allocation2 + $0x74] ss:$8 sps:$4 sm:$0xff]   ;;  %v962_v7 = vld [vmem:[#allocation2 + $0x70] ss:$8 sps:$4 sm:$0xff]   ;;  %v963_v8 = vld [vmem:[#allocation2 + $0x64] ss:$8 sps:$4 sm:$0xff]  }
  0x1f   :  { %118 = vmatprep.subr.bf16.mxu0 %v957_v3  ;;  %353 = vmatprep.subr.bf16.mxu1 %v960_v6  ;;  %v965_v10 = vld [vmem:[#allocation2 + $0x60] ss:$8 sps:$4 sm:$0xff]   ;;  %vm100_vm0 = vcmask 261120   ;;  %v966_v11 = vld [vmem:[#allocation2 + $0x54] ss:$8 sps:$4 sm:$0xff]   ;;  %v70_v3 = vlaneseq  ;;  %vm822_vm1 = vcmask 154624  }
  0x20   :  { %354 = vmatpush1.bf16.msra.mxu1 %v962_v7  ;;  %v968_v12 = vld [vmem:[#allocation2 + $0x50] ss:$8 sps:$4 sm:$0xff]   ;;  %v969_v13 = vld [vmem:[#allocation2 + $0x44] ss:$8 sps:$4 sm:$0xff]   ;;  %v971_v14 = vld [vmem:[#allocation2 + $0x40] ss:$8 sps:$4 sm:$0xff]  }
  0x21   :  { %355 = vmatprep.subr.bf16.mxu1 %v963_v8  ;;  %v972_v15 = vld [vmem:[#allocation2 + $0x34] ss:$8 sps:$4 sm:$0xff]   ;;  %v974_v16 = vld [vmem:[#allocation2 + $0x30] ss:$8 sps:$4 sm:$0xff]   ;;  %v975_v17 = vld [vmem:[#allocation2 + $0x24] ss:$8 sps:$4 sm:$0xff]  }
  0x22   :  { %119 = vmatpush1.bf16.msra.mxu0 %v959_v4  ;;  %v977_v18 = vld [vmem:[#allocation2 + $0x20] ss:$8 sps:$4 sm:$0xff]   ;;  %v978_v19 = vld [vmem:[#allocation2 + $0x14] ss:$8 sps:$4 sm:$0xff]   ;;  %v980_v20 = vld [vmem:[#allocation2 + $0x10] ss:$8 sps:$4 sm:$0xff]  }
  0x23   :  { %v981_v21 = vld [vmem:[#allocation2 + $0x4] ss:$8 sps:$4 sm:$0xff]   ;;  %v983_v22 = vld [vmem:[#allocation2] ss:$8 sps:$4 sm:$0xff]   ;;  %v984_v23 = vld [vmem:[#allocation2 + $0xf4] ss:$8 sps:$4 sm:$0xff]  }
  0x24   :  { %356 = vmatpush1.bf16.msra.mxu1 %v965_v10  ;;  %v986_v24 = vld [vmem:[#allocation2 + $0xf0] ss:$8 sps:$4 sm:$0xff]   ;;  %v987_v25 = vld [vmem:[#allocation2 + $0xe4] ss:$8 sps:$4 sm:$0xff]   ;;  %v989_v26 = vld [vmem:[#allocation2 + $0xe0] ss:$8 sps:$4 sm:$0xff]  }
  0x25   :  { %844 = vmatmul.mubr.msk.bf16.vlgmr.msra.gmra.mxu0 %vm100_vm0, %v63_v9  ;;  %357 = vmatprep.subr.bf16.mxu1 %v966_v11  ;;  %v990_v27 = vld [vmem:[#allocation2 + $0xd4] ss:$8 sps:$4 sm:$0xff]   ;;  %v992_v28 = vld [vmem:[#allocation2 + $0xd0] ss:$8 sps:$4 sm:$0xff]   ;;  %v993_v29 = vld [vmem:[#allocation2 + $0xc4] ss:$8 sps:$4 sm:$0xff]  }
  0x26   :  { %v995_v30 = vld [vmem:[#allocation2 + $0xc0] ss:$8 sps:$4 sm:$0xff]   ;;  %v996_v31 = vld [vmem:[#allocation2 + $0xb4] ss:$8 sps:$4 sm:$0xff]   ;;  %v998_v32 = vld [vmem:[#allocation2 + $0xb0] ss:$8 sps:$4 sm:$0xff]  }
  0x27   :  { %v999_v33 = vld [vmem:[#allocation2 + $0xa4] ss:$8 sps:$4 sm:$0xff]   ;;  %v1001_v34 = vld [vmem:[#allocation2 + $0xa0] ss:$8 sps:$4 sm:$0xff]   ;;  %v1002_v35 = vld [vmem:[#allocation2 + $0x94] ss:$8 sps:$4 sm:$0xff]  }
  0x28   :  { %358 = vmatpush1.bf16.msra.mxu1 %v968_v12  ;;  %v1004_v36 = vld [vmem:[#allocation2 + $0x90] ss:$8 sps:$4 sm:$0xff]   ;;  %v1005_v37 = vld [vmem:[#allocation2 + $0x84] ss:$8 sps:$4 sm:$0xff]   ;;  %v1007_v38 = vld [vmem:[#allocation2 + $0x80] ss:$8 sps:$4 sm:$0xff]  }
  0x29   :  { %359 = vmatprep.subr.bf16.mxu1 %v969_v13  ;;  %v1008_v39 = vld [vmem:[#allocation5 + $0x70] ss:$8 sps:$4 sm:$0xff]   ;;  %v1010_v40 = vld [vmem:[#allocation5 + $0x74] ss:$8 sps:$4 sm:$0xff]   ;;  %v1013_v41 = vld [vmem:[#allocation5 + $0x64] ss:$8 sps:$4 sm:$0xff]  }
  0x2a   :  { %602 = vmatprep.subr.bf16.mxu0 %v1010_v40  ;;  %v1011_v42 = vld [vmem:[#allocation5 + $0x60] ss:$8 sps:$4 sm:$0xff]   ;;  %v1016_v43 = vld [vmem:[#allocation5 + $0x54] ss:$8 sps:$4 sm:$0xff]   ;;  %v1014_v44 = vld [vmem:[#allocation5 + $0x50] ss:$8 sps:$4 sm:$0xff]  }
  0x2b   :  { %603 = vmatpush1.bf16.msra.mxu0 %v1008_v39  ;;  %v1019_v45 = vld [vmem:[#allocation5 + $0x44] ss:$8 sps:$4 sm:$0xff]   ;;  %v1017_v46 = vld [vmem:[#allocation5 + $0x40] ss:$8 sps:$4 sm:$0xff]   ;;  %v1022_v47 = vld [vmem:[#allocation5 + $0x34] ss:$8 sps:$4 sm:$0xff]  }
  0x2c   :  { %360 = vmatpush1.bf16.msra.mxu1 %v971_v14  ;;  %604 = vmatprep.subr.bf16.mxu0 %v1013_v41  ;;  %v1020_v48 = vld [vmem:[#allocation5 + $0x30] ss:$8 sps:$4 sm:$0xff]   ;;  %v1025_v49 = vld [vmem:[#allocation5 + $0x24] ss:$8 sps:$4 sm:$0xff]   ;;  %v1023_v50 = vld [vmem:[#allocation5 + $0x20] ss:$8 sps:$4 sm:$0xff]  }
  0x2d   :  { %361 = vmatprep.subr.bf16.mxu1 %v972_v15  ;;  %v1028_v51 = vld [vmem:[#allocation5 + $0x14] ss:$8 sps:$4 sm:$0xff]   ;;  %v1026_v52 = vld [vmem:[#allocation5 + $0x10] ss:$8 sps:$4 sm:$0xff]   ;;  %v1031_v53 = vld [vmem:[#allocation5 + $0x4] ss:$8 sps:$4 sm:$0xff]  }
  0x2e   :  { %v1029_v54 = vld [vmem:[#allocation5] ss:$8 sps:$4 sm:$0xff]   ;;  %v1034_v55 = vld [vmem:[#allocation5 + $0xf4] ss:$8 sps:$4 sm:$0xff]   ;;  %v1032_v56 = vld [vmem:[#allocation5 + $0xf0] ss:$8 sps:$4 sm:$0xff]  }
  0x2f   :  { %605 = vmatpush1.bf16.msra.mxu0 %v1011_v42  ;;  %v1037_v57 = vld [vmem:[#allocation5 + $0xe4] ss:$8 sps:$4 sm:$0xff]   ;;  %v1035_v58 = vld [vmem:[#allocation5 + $0xe0] ss:$8 sps:$4 sm:$0xff]   ;;  %v1040_v59 = vld [vmem:[#allocation5 + $0xd4] ss:$8 sps:$4 sm:$0xff]  }
  0x30   :  { %362 = vmatpush1.bf16.msra.mxu1 %v974_v16  ;;  %606 = vmatprep.subr.bf16.mxu0 %v1016_v43  ;;  %v1038_v60 = vld [vmem:[#allocation5 + $0xd0] ss:$8 sps:$4 sm:$0xff]   ;;  %v1043_v61 = vld [vmem:[#allocation5 + $0xc4] ss:$8 sps:$4 sm:$0xff]   ;;  %v1041_v62 = vld [vmem:[#allocation5 + $0xc0] ss:$8 sps:$4 sm:$0xff]  }
  0x31   :  { %363 = vmatprep.subr.bf16.mxu1 %v975_v17  ;;  %v1046_v63 = vld [vmem:[#allocation5 + $0xb4] ss:$8 sps:$4 sm:$0xff]   ;;  %v1044_v0 = vld [vmem:[#allocation5 + $0xb0] ss:$8 sps:$4 sm:$0xff]   ;;  %v1049_v1 = vld [vmem:[#allocation5 + $0xa4] ss:$8 sps:$4 sm:$0xff]  }
  0x32   :  { %v1047_v2 = vld [vmem:[#allocation5 + $0xa0] ss:$8 sps:$4 sm:$0xff]   ;;  %v71_v4 = vshrl.u32 %v70_v3, 7 }
  0x33   :  { %607 = vmatpush1.bf16.msra.mxu0 %v1014_v44  ;;  %v68_v6 = vld [vmem:[%s1290_s2] sm:$0x3] }
  0x34   :  { %364 = vmatpush1.bf16.msra.mxu1 %v977_v18  ;;  %608 = vmatprep.subr.bf16.mxu0 %v1019_v45  ;;  %v1215_v5 = vsub.s32 0, %v71_v4  ;;  %v1220_v7 = vsub.s32 1, %v71_v4  ;;  %v909_v3 = vld [vmem:[%s1296_s8] ss:$0 sm:$0xff] }
  0x35   :  { %365 = vmatprep.subr.bf16.mxu1 %v978_v19 }
  0x36   :  { %v73_v8 = vrot.slane %v68_v6, %v1215_v5  ;;  %v77_v9 = vrot.slane %v68_v6, %v1220_v7 }
  0x37   :  { %609 = vmatpush1.bf16.msra.mxu0 %v1017_v46 }
  0x38   :  { %366 = vmatpush1.bf16.msra.mxu1 %v980_v20  ;;  %610 = vmatprep.subr.bf16.mxu0 %v1022_v47  ;;  %v1052_v20 = vld [vmem:[#allocation5 + $0x94] ss:$8 sps:$4 sm:$0xff]  }
  0x39   :  { %367 = vmatprep.subr.bf16.mxu1 %v981_v21  ;;  %v1050_v21 = vld [vmem:[#allocation5 + $0x90] ss:$8 sps:$4 sm:$0xff]  }
  0x3b   :  { %611 = vmatpush1.bf16.msra.mxu0 %v1020_v48 }
  0x3c   :  { %368 = vmatpush1.bf16.msra.mxu1 %v983_v22  ;;  %612 = vmatprep.subr.bf16.mxu0 %v1025_v49  ;;  %v1055_v22 = vld [vmem:[#allocation5 + $0x84] ss:$8 sps:$4 sm:$0xff]  }
  0x3d   :  { %369 = vmatprep.subr.bf16.mxu1 %v984_v23  ;;  %v1053_v23 = vld [vmem:[#allocation5 + $0x80] ss:$8 sps:$4 sm:$0xff]  }
  0x3e   :  { %v1068_v49 = vld [vmem:[%s1295_s7 + $0x48] sm:$0xff]  }
  0x3f   :  { %613 = vmatpush1.bf16.msra.mxu0 %v1023_v50  ;;  %v1069_v50 = vld [vmem:[%s1295_s7 + $0x8] sm:$0xff]  }
  0x40   :  { %370 = vmatpush2.bf16.msra.mxu1 %v986_v24  ;;  %614 = vmatprep.subr.bf16.mxu0 %v1028_v51  ;;  %v1056_v24 = vld [vmem:[%s1295_s7 + $0x78] sm:$0xff]   ;;  %v1070_v51 = vld [vmem:[%s1295_s7 + $0x40] sm:$0xff]  }
  0x41   :  { %371 = vmatprep.subr.bf16.mxu1 %v987_v25  ;;  %v1057_v25 = vld [vmem:[%s1295_s7 + $0x38] sm:$0xff]  }
  0x43   :  { %615 = vmatpush1.bf16.msra.mxu0 %v1026_v52  ;;  %v1071_v52 = vld [vmem:[%s1295_s7] sm:$0xff]  }
  0x44   :  { %372 = vmatpush2.bf16.msra.mxu1 %v989_v26  ;;  %616 = vmatprep.subr.bf16.mxu0 %v1031_v53  ;;  %v1058_v26 = vld [vmem:[%s1295_s7 + $0x70] sm:$0xff]   ;;  %v430_v53 = vld [vmem:[%s1294_s6] sm:$0x3]  ;;  %s1143_s6 = smov [#allocation7]  }
  0x45   :  { %373 = vmatprep.subr.bf16.mxu1 %v990_v27  ;;  %v1059_v27 = vld [vmem:[%s1295_s7 + $0x30] sm:$0xff]   ;;  %s830_s17 = sshll.u32 %s1143_s6, 4  ;;  %s831_s17 = int_to_ptr.vmem [resolvable:$true] %s830_s17 }
  0x46   :  { %s1112_s18 = scalar_lea.vmem %s831_s17, 128  ;;  %p1117_p11 = scmp.lt.s32.totalorder %s831_s17, %s831_s17 }
  0x47   :  { %617 = vmatpush1.bf16.msra.mxu0 %v1029_v54  ;;  %v435_v54 = vrot.slane %v430_v53, %v1215_v5  ;;  %p1113_p10 = scmp.ne.s32.totalorder %s831_s17, %s1112_s18  ;;  %p1118_p12 = scmp.lt.s32.totalorder %s1112_s18, %s1112_s18 }
  0x48   :  { %374 = vmatpush2.bf16.msra.mxu1 %v992_v28  ;;  %618 = vmatprep.subr.bf16.mxu0 %v1034_v55  ;;  %v1060_v28 = vld [vmem:[%s1295_s7 + $0x68] sm:$0xff]   ;;  %v439_v55 = vrot.slane %v430_v53, %v1220_v7 }
  0x49   :  { %375 = vmatprep.subr.bf16.mxu1 %v993_v29  ;;  %v1061_v29 = vld [vmem:[%s1295_s7 + $0x28] sm:$0xff]   ;;  %p1119_p13 = por %p1118_p12, %p1117_p11 }
  0x4b   :  { %619 = vmatpush2.bf16.msra.mxu0 %v1032_v56  ;;  %p1120_p0 = pnand %p1119_p13, %p1113_p10 }
  0x4c   :  { %376 = vmatpush2.bf16.msra.mxu1 %v995_v30  ;;  %620 = vmatprep.subr.bf16.mxu0 %v1037_v57  ;;  %v1062_v30 = vld [vmem:[%s1295_s7 + $0x60] sm:$0xff]  }
  0x4d   :  { %377 = vmatprep.subr.bf16.mxu1 %v996_v31  ;;  %v1063_v31 = vld [vmem:[%s1295_s7 + $0x20] sm:$0xff]  }
  0x4f   :  { %621 = vmatpush2.bf16.msra.mxu0 %v1035_v58 }
  0x50   :  { %378 = vmatpush2.bf16.msra.mxu1 %v998_v32  ;;  %622 = vmatprep.subr.bf16.mxu0 %v1040_v59  ;;  %v1064_v32 = vld [vmem:[%s1295_s7 + $0x58] sm:$0xff]  }
  0x51   :  { %379 = vmatprep.subr.bf16.mxu1 %v999_v33  ;;  %v1065_v33 = vld [vmem:[%s1295_s7 + $0x18] sm:$0xff]  }
  0x53   :  { %623 = vmatpush2.bf16.msra.mxu0 %v1038_v60 }
  0x54   :  { %380 = vmatpush2.bf16.msra.mxu1 %v1001_v34  ;;  %624 = vmatprep.subr.bf16.mxu0 %v1043_v61  ;;  %v1066_v34 = vld [vmem:[%s1295_s7 + $0x50] sm:$0xff]  }
  0x55   :  { %381 = vmatprep.subr.bf16.mxu1 %v1002_v35  ;;  %v1067_v35 = vld [vmem:[%s1295_s7 + $0x10] sm:$0xff]  }
  0x57   :  { %625 = vmatpush2.bf16.msra.mxu0 %v1041_v62 }
  0x58   :  { %382 = vmatpush2.bf16.msra.mxu1 %v1004_v36  ;;  %626 = vmatprep.subr.bf16.mxu0 %v1046_v63  ;;  %v181_v36 = vld [vmem:[%s1292_s4] sm:$0x3] }
  0x59   :  { %383 = vmatprep.subr.bf16.mxu1 %v1005_v37  ;;  %v186_v37 = vrot.slane %v181_v36, %v1215_v5 }
  0x5b   :  { %627 = vmatpush2.bf16.msra.mxu0 %v1044_v0 }
  0x5c   :  { %384 = vmatpush2.bf16.msra.mxu1 %v1007_v38  ;;  %628 = vmatprep.subr.bf16.mxu0 %v1049_v1  ;;  %v190_v38 = vrot.slane %v181_v36, %v1220_v7 }
  0x5d   :  { %926 = vmatprep.subr.bf16.mxu1 %v1056_v24 }
  0x5f   :  { %629 = vmatpush2.bf16.msra.mxu0 %v1047_v2 }
  0x60   :  { %630 = vmatprep.subr.bf16.mxu0 %v1052_v20 }
  0x63   :  { %631 = vmatpush2.bf16.msra.mxu0 %v1050_v21 }
  0x64   :  { %632 = vmatprep.subr.bf16.mxu0 %v1055_v22 }
  0x67   :  { %633 = vmatpush2.bf16.msra.mxu0 %v1053_v23 }
  0xe5   :  { %v138_v10 = vpop.f32.mrf.mxu0 }
  0xe6   :  { %v139_v11 = vadd.f32 %v138_v10, %v73_v8 }
  0xe7   :  { %v140_v12 = vpop.f32.mrf.mxu0 }
  0xe8   :  { %v141_v13 = vadd.f32 %v140_v12, %v77_v9  ;;  %v145_v14 = vmax.f32 %v139_v11, 0.0 }
  0xe9   :  { %v142_v15 = vpop.f32.mrf.mxu0 }
  0xea   :  { %v146_v16 = vmax.f32 %v141_v13, 0.0  ;;  %v147_v19 = vpack.c.bf16 %v145_v14, %v145_v14 }
  0xeb   :  { %v143_v17 = vpop.f32.mrf.mxu0 }
  0xec   :  { %v148_v18 = vpack.c.bf16 %v146_v16, %v146_v16 }
  0xee   :  { %385 = vmatprep.mubr.bf16.mxu1 %v148_v18 }
  0xef   :  { %386 = vmatmul.mubr.bf16.vlgmr.msra.gmra.mxu1 %v147_v19 }
  0xf0   :  { %927 = vmatpush3.bf16.msra.mxu1 %v1057_v25 }
  0xf1   :  { %928 = vmatprep.subr.bf16.mxu1 %v1058_v26 }
  0xf4   :  { %929 = vmatpush3.bf16.msra.mxu1 %v1059_v27 }
  0xf5   :  { %930 = vmatprep.subr.bf16.mxu1 %v1060_v28 }
  0xf8   :  { %931 = vmatpush3.bf16.msra.mxu1 %v1061_v29 }
  0xf9   :  { %932 = vmatprep.subr.bf16.mxu1 %v1062_v30 }
  0xfc   :  { %933 = vmatpush3.bf16.msra.mxu1 %v1063_v31 }
  0xfd   :  { %934 = vmatprep.subr.bf16.mxu1 %v1064_v32 }
 0x100   :  { %935 = vmatpush3.bf16.msra.mxu1 %v1065_v33 }
 0x101   :  { %936 = vmatprep.subr.bf16.mxu1 %v1066_v34 }
 0x104   :  { %937 = vmatpush3.bf16.msra.mxu1 %v1067_v35 }
 0x105   :  { %938 = vmatprep.subr.bf16.mxu1 %v1068_v49 }
 0x108   :  { %939 = vmatpush3.bf16.msra.mxu1 %v1069_v50 }
 0x109   :  { %940 = vmatprep.subr.bf16.mxu1 %v1070_v51 }
 0x10c   :  { %941 = vmatpush3.bf16.msra.mxu1 %v1071_v52 }
 0x1af   :  { %v387_v39 = vpop.f32.mrf.mxu1 }
 0x1b0   :  { %v388_v40 = vadd.f32 %v387_v39, %v186_v37 }
 0x1b1   :  { %v389_v41 = vpop.f32.mrf.mxu1 }
 0x1b2   :  { %v390_v42 = vadd.f32 %v389_v41, %v190_v38  ;;  %v394_v43 = vmax.f32 %v388_v40, 0.0 }
 0x1b3   :  { %v391_v44 = vpop.f32.mrf.mxu1 }
 0x1b4   :  { %v395_v45 = vmax.f32 %v390_v42, 0.0  ;;  %v396_v48 = vpack.c.bf16 %v394_v43, %v394_v43 }
 0x1b5   :  { %v392_v46 = vpop.f32.mrf.mxu1 }
 0x1b6   :  { %v397_v47 = vpack.c.bf16 %v395_v45, %v395_v45 }
 0x1b8   :  { %634 = vmatprep.mubr.bf16.mxu0 %v397_v47 }
 0x1b9   :  { %635 = vmatmul.mubr.bf16.vlgmr.msra.gmra.mxu0 %v396_v48 }
 0x279   :  { %v636_v56 = vpop.f32.mrf.mxu0 }
 0x27a   :  { %v637_v57 = vadd.f32 %v636_v56, %v435_v54 }
 0x27b   :  { %v638_v58 = vpop.f32.mrf.mxu0 }
 0x27c   :  { %v639_v59 = vadd.f32 %v638_v58, %v439_v55  ;;  %v643_v60 = vmax.f32 %v637_v57, 0.0 }
 0x27d   :  { %v640_v61 = vpop.f32.mrf.mxu0 }
 0x27e   :  { %v644_v62 = vmax.f32 %v639_v59, 0.0  ;;  %v645_v1 = vpack.c.bf16 %v643_v60, %v643_v60 }
 0x27f   :  { %v641_v63 = vpop.f32.mrf.mxu0 }
 0x280   :  { %v646_v0 = vpack.c.bf16 %v644_v62, %v644_v62 }
 0x282   :  { %814 = vmatprep.mubr.bf16.mxu1 %v646_v0 }
 0x283   :  { %815 = vmatmul.mubr.bf16.vlgmr.msra.gmra.mxu1 %v645_v1 }
 0x343   :  { %v942_v2 = vpop.f32.mrf.mxu1 }
 0x345   :  { %v943_v4 = vpop.f32.mrf.mxu1 }
 0x346   :  { %v944_v5 = vadd.f32 %v943_v4, %v942_v2 }
 0x347   :  { %v945_v6 = vpop.f32.mrf.mxu1 }
 0x348   :  { %v817_v7 = vadd.f32 %v944_v5, %v909_v3 }
 0x349   :  { %v946_v8 = vpop.f32.mrf.mxu1 }
 0x34a   :  { %823 = vst.msk [vmem:[#allocation7] sm:$0xff] %vm822_vm1, %v817_v7 }
 0x34b   :  { %1123 = shalt.err (!%p1120_p0)
}
 0x34c   :  { %833 = dma.vmem_to_hbm [thread:$0]  %s831_s17, 128, %s1297_s9, [#allocation4]  }
 0x34d   :  { %1136 = dma.done.wait [#allocation4], 128  }
 0x34e   :  { %1137 = vsyncadd [#allocation4], 4294967168 }
 0x34f   :  { %837 = vsyncpa [#allocation3], 1 }
 0x350   :  { %838 = vsyncpa [#allocation6], 1 }
 0x351   :  { %839 = vsyncpa [#allocation4], 1 }

</bundles_post_ra>
